<compile_context>
chip_gen: v5e
topology: v5e:2x2
jax: 0.10.0
libtpu: 0.0.40
codegen_flags: <defaults>
</compile_context>

<pallas_src>
import numpy as np
import jax
import jax.numpy as jnp
from jax import lax
from jax.experimental import pallas as pl
from jax.experimental.pallas import tpu as pltpu


# ------------------------------------------------------------------------
# Static selection tensors reproducing the exact (buggy) torch construction:
#   atom_trans = cat([af.repeat(1,1,N).view(B,N*N,-1), af.repeat(1,N,1)],
#                    dim=1).view(B, N, N, 2F)
# so that   atom_trans[b, i, j, :F] = af[b, idx1(i, j)]
#           atom_trans[b, i, j, F:] = af[b, idx2(i, j)]
# ------------------------------------------------------------------------
def _selection_one_hots(N):
    i = np.arange(N)[:, None]
    j = np.arange(N)[None, :]
    r1 = 2 * i * N + 2 * j            # flat row in the concatenated (2*N*N, F)
    r2 = r1 + 1
    NN = N * N
    # rows < N*N come from part1 (af[r // N]); rows >= N*N from part2 (af[r % N])
    idx1 = np.where(r1 < NN, r1 // N, r1 % N)
    idx2 = np.where(r2 < NN, r2 // N, r2 % N)
    n = np.arange(N)
    sel1 = (idx1[..., None] == n).astype(np.float32)   # (N, N, N)
    sel2 = (idx2[..., None] == n).astype(np.float32)   # (N, N, N)
    return jnp.asarray(sel1), jnp.asarray(sel2)


# ------------------------------------------------------------------------
# Fused kernel: projection + attention scores + masked softmax + aggregation,
# one batch element per grid step (everything stays in VMEM).
# ------------------------------------------------------------------------
def _gat_out_kernel(x_ref, w_ref, a12_ref, sel1_ref, sel2_ref, adj_ref, o_ref):
    N = adj_ref.shape[1]

    # 1) feature projection on the MXU:  af = x_b @ W                (N, F)
    af = jnp.dot(x_ref[0], w_ref[...], preferred_element_type=jnp.float32)

    # 2) per-node attention scores in lane-major form:
    #    s = [a1 ; a2] . af^T   ->  (2, N);  s[0] = af @ a1, s[1] = af @ a2
    s = lax.dot_general(a12_ref[...], af,
                        dimension_numbers=(((1,), (1,)), ((), ())),
                        preferred_element_type=jnp.float32)
    s1 = jnp.reshape(s[0:1, :], (1, 1, N))
    s2 = jnp.reshape(s[1:2, :], (1, 1, N))

    # 3) e[i, j] = s1[idx1(i, j)] + s2[idx2(i, j)]  via static one-hots,
    #    then LeakyReLU (slope 0.01).
    e = jnp.sum(sel1_ref[...] * s1 + sel2_ref[...] * s2, axis=-1)     # (N, N)
    e = jnp.where(e > 0.0, e, 0.01 * e)

    # 4) adjacency-masked softmax over j (divide on the EUP).
    att = jnp.where(adj_ref[0] > 0.0, e, jnp.float32(-9.0e15))
    att = att - jnp.max(att, axis=-1, keepdims=True)
    p = jnp.exp(att)
    attn = p * pl.reciprocal(jnp.sum(p, axis=-1, keepdims=True), approx=True)

    # TODO(synk): nn.Dropout(gnn_dropout) is identity in eval mode; skipped.

    # 5) h1 = attention @ atom_feature on the MXU, then ELU.
    h1 = jnp.dot(attn, af, preferred_element_type=jnp.float32)        # (N, F)
    o_ref[0] = jnp.where(h1 > 0.0, h1,
                         jnp.exp(jnp.minimum(h1, 0.0)) - 1.0).astype(o_ref.dtype)


def gat_layer_out_forward(inp, adj, W, a):
    """GATLayerOut.forward (eval mode, smiles=None) as a single fused kernel."""
    B, N, in_f = inp.shape
    F = W.shape[1]
    a12 = a.reshape(2, F)                 # row 0 = a[:F, 0], row 1 = a[F:, 0]
    sel1, sel2 = _selection_one_hots(N)

    return pl.pallas_call(
        _gat_out_kernel,
        out_shape=jax.ShapeDtypeStruct((B, N, F), jnp.float32),
        grid=(B,),
        in_specs=[
            pl.BlockSpec((1, N, in_f), lambda b: (b, 0, 0)),   # x_b
            pl.BlockSpec((in_f, F), lambda b: (0, 0)),         # W   (shared)
            pl.BlockSpec((2, F), lambda b: (0, 0)),            # [a1; a2]
            pl.BlockSpec((N, N, N), lambda b: (0, 0, 0)),      # sel1 (static)
            pl.BlockSpec((N, N, N), lambda b: (0, 0, 0)),      # sel2 (static)
            pl.BlockSpec((1, N, N), lambda b: (b, 0, 0)),      # adj_b
        ],
        out_specs=pl.BlockSpec((1, N, F), lambda b: (b, 0, 0)),
        compiler_params=pltpu.CompilerParams(
            dimension_semantics=("parallel",),
            vmem_limit_bytes=32 * 1024 * 1024),
    )(inp, W, a12, sel1, sel2, adj)


# ------------------------------------------------------------------------
# Pure-JAX reference mirroring the torch code line by line (materializes
# atom_trans the slow way) -- used only to validate the fused kernel.
# ------------------------------------------------------------------------
def _reference(x, adj, W, a):
    B, N, _ = x.shape
    F = W.shape[1]
    af = x @ W
    p1 = jnp.tile(af, (1, 1, N)).reshape(B, N * N, F)
    p2 = jnp.tile(af, (1, N, 1))
    at = jnp.concatenate([p1, p2], axis=1).reshape(B, N, N, 2 * F)
    e = jnp.squeeze(at @ a, -1)
    e = jnp.where(e > 0, e, 0.01 * e)
    att = jnp.where(adj > 0, e, jnp.float32(-9.0e15))
    att = jax.nn.softmax(att, axis=2)
    h1 = att @ af
    return jnp.where(h1 > 0, h1, jnp.exp(jnp.minimum(h1, 0.0)) - 1.0)


def _make_inputs(key, B, N, in_features, out_features):
    k_w, k_a, k_x, k_adj = jax.random.split(key, 4)
    gain = 1.414                                  # xavier_uniform_ gain
    bw = gain * np.sqrt(6.0 / (in_features + out_features))
    W = jax.random.uniform(k_w, (in_features, out_features), jnp.float32, -bw, bw)
    ba = gain * np.sqrt(6.0 / (2 * out_features + 1))
    a = jax.random.uniform(k_a, (2 * out_features, 1), jnp.float32, -ba, ba)
    x = jax.random.normal(k_x, (B, N, in_features), jnp.float32)
    adj = (jax.random.uniform(k_adj, (B, N, N)) > 0.5).astype(jnp.float32)
    adj = jnp.maximum(adj, jnp.eye(N, dtype=jnp.float32)[None])   # self loops
    return x, adj, W, a


if __name__ == "__main__":
    key = jax.random.PRNGKey(0)
    # Even and odd N both exercise the exact (buggy) cat/view index pattern.
    cases = [(2, 8, 16, 32), (2, 7, 16, 32)]
    for idx, (B, N, in_f, F) in enumerate(cases):
        x, adj, W, a = _make_inputs(jax.random.fold_in(key, idx), B, N, in_f, F)
        out = jax.block_until_ready(gat_layer_out_forward(x, adj, W, a))
        ref = _reference(x, adj, W, a)
        assert out.shape == (B, N, F)
        # Tolerance loosened slightly vs. f32 divide because the softmax
        # denominator uses the EUP approximate reciprocal.
        np.testing.assert_allclose(np.asarray(out), np.asarray(ref),
                                   rtol=2e-3, atol=2e-3)
    print("KERNEL_OK")
</pallas_src>

<mosaic_0001>
module attributes {stable_mosaic.version = 11 : i64} {
  func.func @_gat_out_kernel(%arg0: i32, %arg1: memref<1x8x16xf32, #tpu.memory_space<vmem>>, %arg2: memref<16x32xf32, #tpu.memory_space<vmem>>, %arg3: memref<2x32xf32, #tpu.memory_space<vmem>>, %arg4: memref<8x8x8xf32, #tpu.memory_space<vmem>>, %arg5: memref<8x8x8xf32, #tpu.memory_space<vmem>>, %arg6: memref<1x8x8xf32, #tpu.memory_space<vmem>>, %arg7: memref<1x8x32xf32, #tpu.memory_space<vmem>>) attributes {dimension_semantics = [#tpu.dimension_semantics<parallel>], iteration_bounds = array<i64: 2>, scalar_prefetch = 0 : i64, scratch_operands = 0 : i64, tpu.core_type = #tpu.core_type<tc>, window_params = [{transform_indices = @transform_0, window_bounds = array<i64: 1, 8, 16>}, {pipeline_mode = #tpu.pipeline_mode<synchronous>, transform_indices = @transform_1, window_bounds = array<i64: 16, 32>}, {pipeline_mode = #tpu.pipeline_mode<synchronous>, transform_indices = @transform_2, window_bounds = array<i64: 2, 32>}, {pipeline_mode = #tpu.pipeline_mode<synchronous>, transform_indices = @transform_3, window_bounds = array<i64: 8, 8, 8>}, {pipeline_mode = #tpu.pipeline_mode<synchronous>, transform_indices = @transform_4, window_bounds = array<i64: 8, 8, 8>}, {transform_indices = @transform_5, window_bounds = array<i64: 1, 8, 8>}, {transform_indices = @transform_6, window_bounds = array<i64: 1, 8, 32>}]} {
    %c0 = arith.constant 0 : index
    %c0_0 = arith.constant 0 : index
    %c0_1 = arith.constant 0 : index
    %0 = vector.load %arg1[%c0, %c0_0, %c0_1] : memref<1x8x16xf32, #tpu.memory_space<vmem>>, vector<1x8x16xf32>
    %1 = vector.shape_cast %0 : vector<1x8x16xf32> to vector<8x16xf32>
    %c0_2 = arith.constant 0 : index
    %c0_3 = arith.constant 0 : index
    %2 = vector.load %arg2[%c0_2, %c0_3] : memref<16x32xf32, #tpu.memory_space<vmem>>, vector<16x32xf32>
    %cst = arith.constant dense<0.000000e+00> : vector<8x32xf32>
    %3 = tpu.matmul %1, %2, %cst {dimension_numbers = #tpu.dot_dimension_numbers<[1], [0], [0], [1], [0, 0, 1, 1], [], []>} : vector<8x16xf32>, vector<16x32xf32>, vector<8x32xf32> -> vector<8x32xf32>
    %c0_4 = arith.constant 0 : index
    %c0_5 = arith.constant 0 : index
    %4 = vector.load %arg3[%c0_4, %c0_5] : memref<2x32xf32, #tpu.memory_space<vmem>>, vector<2x32xf32>
    %cst_6 = arith.constant dense<0.000000e+00> : vector<2x8xf32>
    %5 = tpu.matmul %4, %3, %cst_6 {dimension_numbers = #tpu.dot_dimension_numbers<[1], [1], [0], [0], [0, 0, 1, 0], [], []>} : vector<2x32xf32>, vector<8x32xf32>, vector<2x8xf32> -> vector<2x8xf32>
    %6 = vector.extract_strided_slice %5 {offsets = [0, 0], sizes = [1, 8], strides = [1, 1]} : vector<2x8xf32> to vector<1x8xf32>
    %7 = vector.shape_cast %6 : vector<1x8xf32> to vector<1x1x8xf32>
    %8 = vector.extract_strided_slice %5 {offsets = [1, 0], sizes = [1, 8], strides = [1, 1]} : vector<2x8xf32> to vector<1x8xf32>
    %9 = vector.shape_cast %8 : vector<1x8xf32> to vector<1x1x8xf32>
    %c0_7 = arith.constant 0 : index
    %c0_8 = arith.constant 0 : index
    %c0_9 = arith.constant 0 : index
    %10 = vector.load %arg4[%c0_7, %c0_8, %c0_9] : memref<8x8x8xf32, #tpu.memory_space<vmem>>, vector<8x8x8xf32>
    %11 = vector.broadcast %7 : vector<1x1x8xf32> to vector<8x8x8xf32>
    %12 = arith.mulf %10, %11 : vector<8x8x8xf32>
    %c0_10 = arith.constant 0 : index
    %c0_11 = arith.constant 0 : index
    %c0_12 = arith.constant 0 : index
    %13 = vector.load %arg5[%c0_10, %c0_11, %c0_12] : memref<8x8x8xf32, #tpu.memory_space<vmem>>, vector<8x8x8xf32>
    %14 = vector.broadcast %9 : vector<1x1x8xf32> to vector<8x8x8xf32>
    %15 = arith.mulf %13, %14 : vector<8x8x8xf32>
    %16 = arith.addf %12, %15 : vector<8x8x8xf32>
    %cst_13 = arith.constant dense<0.000000e+00> : vector<8x8xf32>
    %17 = vector.multi_reduction <add>, %16, %cst_13 [2] : vector<8x8x8xf32> to vector<8x8xf32>
    %cst_14 = arith.constant 0.000000e+00 : f32
    %18 = vector.broadcast %cst_14 : f32 to vector<8x8xf32>
    %19 = arith.cmpf ogt, %17, %18 : vector<8x8xf32>
    %cst_15 = arith.constant 0.00999999977 : f32
    %20 = vector.broadcast %cst_15 : f32 to vector<8x8xf32>
    %21 = arith.mulf %20, %17 : vector<8x8xf32>
    %22 = arith.select %19, %17, %21 : vector<8x8xi1>, vector<8x8xf32>
    %c0_16 = arith.constant 0 : index
    %c0_17 = arith.constant 0 : index
    %c0_18 = arith.constant 0 : index
    %23 = vector.load %arg6[%c0_16, %c0_17, %c0_18] : memref<1x8x8xf32, #tpu.memory_space<vmem>>, vector<1x8x8xf32>
    %24 = vector.shape_cast %23 : vector<1x8x8xf32> to vector<8x8xf32>
    %cst_19 = arith.constant 0.000000e+00 : f32
    %25 = vector.broadcast %cst_19 : f32 to vector<8x8xf32>
    %26 = arith.cmpf ogt, %24, %25 : vector<8x8xf32>
    %cst_20 = arith.constant -9.000000e+15 : f32
    %27 = vector.broadcast %cst_20 : f32 to vector<8x8xf32>
    %28 = arith.select %26, %22, %27 : vector<8x8xi1>, vector<8x8xf32>
    %cst_21 = arith.constant dense<0xFF800000> : vector<8xf32>
    %29 = vector.multi_reduction <maximumf>, %28, %cst_21 [1] : vector<8x8xf32> to vector<8xf32>
    %30 = vector.shape_cast %29 : vector<8xf32> to vector<8x1xf32>
    %31 = vector.broadcast %30 : vector<8x1xf32> to vector<8x8xf32>
    %32 = arith.subf %28, %31 : vector<8x8xf32>
    %33 = math.exp %32 : vector<8x8xf32>
    %cst_22 = arith.constant dense<0.000000e+00> : vector<8xf32>
    %34 = vector.multi_reduction <add>, %33, %cst_22 [1] : vector<8x8xf32> to vector<8xf32>
    %35 = vector.shape_cast %34 : vector<8xf32> to vector<8x1xf32>
    %36 = tpu.reciprocal %35 {approx = true} : vector<8x1xf32> -> vector<8x1xf32>
    %37 = vector.broadcast %36 : vector<8x1xf32> to vector<8x8xf32>
    %38 = arith.mulf %33, %37 : vector<8x8xf32>
    %cst_23 = arith.constant dense<0.000000e+00> : vector<8x32xf32>
    %39 = tpu.matmul %38, %3, %cst_23 {dimension_numbers = #tpu.dot_dimension_numbers<[1], [0], [0], [1], [0, 0, 1, 1], [], []>} : vector<8x8xf32>, vector<8x32xf32>, vector<8x32xf32> -> vector<8x32xf32>
    %cst_24 = arith.constant 0.000000e+00 : f32
    %40 = vector.broadcast %cst_24 : f32 to vector<8x32xf32>
    %41 = arith.cmpf ogt, %39, %40 : vector<8x32xf32>
    %cst_25 = arith.constant 0.000000e+00 : f32
    %42 = vector.broadcast %cst_25 : f32 to vector<8x32xf32>
    %43 = arith.minimumf %39, %42 : vector<8x32xf32>
    %44 = math.exp %43 : vector<8x32xf32>
    %cst_26 = arith.constant 1.000000e+00 : f32
    %45 = vector.broadcast %cst_26 : f32 to vector<8x32xf32>
    %46 = arith.subf %44, %45 : vector<8x32xf32>
    %47 = arith.select %41, %39, %46 : vector<8x32xi1>, vector<8x32xf32>
    %c0_27 = arith.constant 0 : index
    %c0_28 = arith.constant 0 : index
    %c0_29 = arith.constant 0 : index
    %48 = vector.load %arg7[%c0_27, %c0_28, %c0_29] : memref<1x8x32xf32, #tpu.memory_space<vmem>>, vector<1x8x32xf32>
    %49 = vector.shape_cast %48 : vector<1x8x32xf32> to vector<8x32xf32>
    %50 = vector.shape_cast %47 : vector<8x32xf32> to vector<1x8x32xf32>
    tpu.vector_store %arg7[%c0_27, %c0_28, %c0_29], %50 {strides = array<i32>} : memref<1x8x32xf32, #tpu.memory_space<vmem>>, vector<1x8x32xf32>,
    return
  }
  func.func @transform_0(%arg0: i32) -> (i32, i32, i32) {
    %c0_i32 = arith.constant 0 : i32
    %c0_i32_0 = arith.constant 0 : i32
    %c0_i32_1 = arith.constant 0 : i32
    return %arg0, %c0_i32, %c0_i32_0 : i32, i32, i32
  }
  func.func @transform_1(%arg0: i32) -> (i32, i32) {
    %c0_i32 = arith.constant 0 : i32
    %c0_i32_0 = arith.constant 0 : i32
    %c0_i32_1 = arith.constant 0 : i32
    return %c0_i32, %c0_i32_0 : i32, i32
  }
  func.func @transform_2(%arg0: i32) -> (i32, i32) {
    %c0_i32 = arith.constant 0 : i32
    %c0_i32_0 = arith.constant 0 : i32
    %c0_i32_1 = arith.constant 0 : i32
    return %c0_i32, %c0_i32_0 : i32, i32
  }
  func.func @transform_3(%arg0: i32) -> (i32, i32, i32) {
    %c0_i32 = arith.constant 0 : i32
    %c0_i32_0 = arith.constant 0 : i32
    %c0_i32_1 = arith.constant 0 : i32
    %c0_i32_2 = arith.constant 0 : i32
    return %c0_i32, %c0_i32_0, %c0_i32_1 : i32, i32, i32
  }
  func.func @transform_4(%arg0: i32) -> (i32, i32, i32) {
    %c0_i32 = arith.constant 0 : i32
    %c0_i32_0 = arith.constant 0 : i32
    %c0_i32_1 = arith.constant 0 : i32
    %c0_i32_2 = arith.constant 0 : i32
    return %c0_i32, %c0_i32_0, %c0_i32_1 : i32, i32, i32
  }
  func.func @transform_5(%arg0: i32) -> (i32, i32, i32) {
    %c0_i32 = arith.constant 0 : i32
    %c0_i32_0 = arith.constant 0 : i32
    %c0_i32_1 = arith.constant 0 : i32
    return %arg0, %c0_i32, %c0_i32_0 : i32, i32, i32
  }
  func.func @transform_6(%arg0: i32) -> (i32, i32, i32) {
    %c0_i32 = arith.constant 0 : i32
    %c0_i32_0 = arith.constant 0 : i32
    %c0_i32_1 = arith.constant 0 : i32
    return %arg0, %c0_i32, %c0_i32_0 : i32, i32, i32
  }
}

</mosaic_0001>

<bundles_post_ra>
// kernel: tpu_custom_call.1
= control target key start
LH: loop header
LB: loop body
LE: loop exit
PB: predicated region body
PF: predicated region fallthrough
CT: control target
= control target key end

     0   :  { %s1386_s0 = inlined_call_operand.hbm [shape: f32[2,8,16], index: 0, kind: input, shape index: {}]   ;;  %s1387_s1 = inlined_call_operand.hbm [shape: f32[16,32], index: 1, kind: input, shape index: {}]   ;;  %s1388_s2 = inlined_call_operand.hbm [shape: f32[2,32], index: 2, kind: input, shape index: {}]   ;;  %s1389_s3 = inlined_call_operand.hbm [shape: f32[8,8,8], index: 3, kind: input, shape index: {}]   ;;  %s1390_s4 = inlined_call_operand.hbm [shape: f32[8,8,8], index: 4, kind: input, shape index: {}]   ;;  %s1391_s5 = inlined_call_operand.hbm [shape: f32[2,8,8], index: 5, kind: input, shape index: {}]   ;;  %s1392_s6 = inlined_call_operand.hbm [shape: f32[2,8,32], index: 6, kind: output, shape index: {}]  }
   0x1   :  { %1393 = sst [smem:[#allocation20_spill]] %s1387_s1 }
   0x2   :  { %1394 = sst [smem:[#allocation21_spill]] %s1388_s2 }
   0x3   :  { %1395 = sst [smem:[#allocation22_spill]] %s1389_s3 }
   0x4   :  { %1396 = sst [smem:[#allocation23_spill]] %s1390_s4 }
   0x5   :  { %11 = vsyncpa [#allocation3], 0 }
   0x6   :  { %13 = vsyncpa [#allocation3 + $0x1], 0 }
   0x7   :  { %14 = vsyncpa [#allocation6], 0 }
   0x8   :  { %15 = vsyncpa [#allocation9], 0 }
   0x9   :  { %16 = vsyncpa [#allocation12], 0 }
   0xa   :  { %18 = vsyncpa [#allocation12 + $0x1], 0 }
   0xb   :  { %19 = vsyncpa [#allocation4], 0 }
   0xc   :  { %21 = vsyncpa [#allocation4 + $0x1], 0  ;;  %s1171_s21 = smov 0   ;;  %s1173_s22 = smov 0  }
   0xd   :  { %s1175_s23 = smov 0   ;;  %s1177_s24 = smov 0  }
   0xe LB: > { %s1397_s1 = sld [smem:[#allocation20_spill]]  ;;  %s1195_s28 = sadd.s32 4294967295, %s1128_s24   ;;  %s1128_s24 = sphi %s1177_s24, %s1414_s24   ;;  %s1124_s23 = sphi %s1175_s23, %s1413_s23   ;;  %s1120_s22 = sphi %s1173_s22, %s1412_s22   ;;  %s1116_s21 = sphi %s1171_s21, %s1411_s21  }
   0xf   : > { %p743_p0 = scmp.ge.s32.totalorder %s1128_s24, 1  ;;  %p48_p1 = scmp.eq.s32.totalorder %s1195_s28, 0 }
  0x10   : > { %p194_p2 = scmp.lt.s32.totalorder %s1128_s24, 3  ;;  %s1130_s30 = smov [#allocation5]  }
  0x11   : > { %s207_s7 = sshll.u32 %s1130_s30, 4  ;;  %s1399_s3 = sld [smem:[#allocation22_spill]]  ;;  %s208_s7 = int_to_ptr.vmem [resolvable:$true] %s207_s7 }
  0x12   : > { %p1200_p3 = pnand %p743_p0, %p194_p2  ;;  %s1401_s2 = sld [smem:[#allocation21_spill]] }
  0x13   : > { %s1131_s15 = smov [#allocation8]   ;;  %s1132_s17 = smov 128  }
  0x14   : > { %s205_s27 = sshll.u32 %s1397_s1, 4  ;;  %p792_p4 = pneg %p1200_p3  ;;  %s206_s27 = int_to_ptr.hbm [resolvable:$true] %s205_s27 }
  0x15   : > { %s233_s16 = sshll.u32 %s1131_s15, 4  ;;  %s1133_s18 = smov 8   ;;  %s234_s16 = int_to_ptr.vmem [resolvable:$true] %s233_s16 }
  0x16   : > { %p1212_p6 = pnand %p792_p4, %p48_p1  ;;  %s1402_s4 = sld [smem:[#allocation23_spill]] }
  0x17   : > { %s231_s10 = sshll.u32 %s1399_s3, 4  ;;  %s1134_s26 = smov [#allocation7]   ;;  %s232_s10 = int_to_ptr.hbm [resolvable:$true] %s231_s10 }
  0x18   : > { %s220_s14 = sshll.u32 %s1401_s2, 4  ;;  %s222_s30 = sshll.u32 %s1134_s26, 4  ;;  %s221_s14 = int_to_ptr.hbm [resolvable:$true] %s220_s14  ;;  %s223_s30 = int_to_ptr.vmem [resolvable:$true] %s222_s30 }
  0x19   : > { %795 = dma.hbm_to_vmem [thread:$0]  (!%p1212_p6), %s206_s27, 256, %s208_s7, [#allocation6], %s1132_s17, %s1132_s17, %s1133_s18  }
  0x1a   : > { %801 = dma.hbm_to_vmem [thread:$0]  (!%p1212_p6), %s232_s10, 1024, %s234_s16, [#allocation9], %s1132_s17, %s1132_s17, %s1133_s18  }
  0x1b   : > { %798 = dma.hbm_to_vmem [thread:$0]  (!%p1212_p6), %s221_s14, 32, %s223_s30, [#allocation6]  }
  0x1c   : > { %s245_s25 = sshll.u32 %s1402_s4, 4  ;;  %s1135_s27 = smov [#allocation10]   ;;  %s246_s25 = int_to_ptr.hbm [resolvable:$true] %s245_s25 }
  0x1d   : > { %s247_s7 = sshll.u32 %s1135_s27, 4  ;;  %s742_s8 = sadd.s32 4294967294, %s1128_s24   ;;  %s248_s7 = int_to_ptr.vmem [resolvable:$true] %s247_s7 }
  0x1e   : > { %804 = dma.hbm_to_vmem [thread:$0]  (!%p1212_p6), %s246_s25, 1024, %s248_s7, [#allocation9], %s1132_s17, %s1132_s17, %s1133_s18  }
  0x1f   : > { %s1232_s9 = sadd.s32 1, %s1128_s24   ;;  %s34_s12 = sadd.s32 1, %s1124_s23 }
  0x20   : > { %s31_s10 = ssub.s32 %s1128_s24, %s1232_s9  ;;  %p41_p8 = scmp.ne.s32.totalorder %s1124_s23, %s1120_s22 }
  0x21   : > { %p32_p7 = scmp.eq.s32.totalorder %s31_s10, 0  ;;  %p42_p9 = scmp.eq.s32.totalorder %s1128_s24, 0 }
  0x22   : > { %p47_p10 = scmp.ne.s32.totalorder %s1120_s22, %s1116_s21  ;;  %p181_p13 = scmp.eq.s32.totalorder %s1195_s28, 1 }
  0x23   : > { %s1243_s13 = scalar_select %p32_p7, %s1124_s23, %s34_s12  }
  0x24   : > { %p1245_p11 = por %p42_p9, %p41_p8  ;;  %p1251_p12 = por %p48_p1, %p47_p10 }
  0x25   : > { %1403 = sst [smem:[#allocation19_spill]] %s1243_s13  ;;  %p187_p0 = scmp.eq.s32.totalorder %s742_s8, 1 }
  0x26   : > { %p820_p2 = scmp.lt.s32.totalorder %s1128_s24, 2  ;;  %s1258_s15 = sand.u32 1, %s1124_s23  }
  0x27   : > { %p1260_p4 = por %p181_p13, %p41_p8  ;;  %p1264_p6 = por %p187_p0, %p47_p10 }
  0x28   : > { %s749_s18 = sshll.u32 %s1258_s15, 3  ;;  %s750_s19 = sshll.u32 %s1128_s24, 3 }
  0x29   : > { %s269_s26 = scalar_lea.hbm %s1386_s0, %s750_s19  ;;  %s265_s30 = scalar_lea.vmem [#allocation2], %s749_s18 }
  0x2a   : > { %s273_s27 = sshll.u32 %s265_s30, 4  ;;  %s271_s7 = sshll.u32 %s269_s26, 4  ;;  %s274_s27 = int_to_ptr.vmem [resolvable:$true] %s273_s27  ;;  %s272_s7 = int_to_ptr.hbm [resolvable:$true] %s271_s7 }
  0x2b   : > { %p1275_p7 = pnand %p820_p2, %p1245_p11  ;;  %s288_s1 = scalar_lea.hbm %s1391_s5, %s750_s19 }
  0x2c   : > { %s262_s2 = scalar_lea.sflag [#allocation3], %s1258_s15  ;;  %s990_s3 = sshra.s32 %s272_s7, 4  ;;  %s991_s3 = int_to_ptr.hbm [resolvable:$true] %s990_s3 }
  0x2d   : > { %s992_s20 = scalar_lea.hbm %s991_s3, 8  ;;  %p994_p9 = pneg %p1275_p7 }
  0x2e   : > { %p993_p8 = scmp.ne.s32.totalorder %s991_s3, %s992_s20  ;;  %s997_s26 = scalar_lea.hbm %s1386_s0, 16 }
  0x2f   : > { %p998_p13 = scmp.lt.s32.totalorder %s991_s3, %s1386_s0  ;;  %p999_p0 = scmp.lt.s32.totalorder %s997_s26, %s992_s20 }
  0x30   : > { %p995_p10 = pnand %p994_p9, %p993_p8 }
  0x31   : > { %p1000_p2 = por %p999_p0, %p998_p13 }
  0x32   : > { %p996_p11 = pneg %p995_p10 }
  0x34   : > { %p1001_p5 = pnand %p1000_p2, %p996_p11 }
  0x36   : > { %1004 = shalt.err (!%p1001_p5)
}
  0x37   : > { %808 = dma.hbm_to_vmem [thread:$0]  (!%p1275_p7), %s272_s7, 128, %s274_s27, %s262_s2  }
  0x38   : > { %s290_s19 = sshll.u32 %s288_s1, 4  ;;  %s284_s12 = scalar_lea.vmem [#allocation11], %s749_s18  ;;  %s291_s19 = int_to_ptr.hbm [resolvable:$true] %s290_s19 }
  0x39   : > { %s292_s4 = sshll.u32 %s284_s12, 4  ;;  %s281_s14 = scalar_lea.sflag [#allocation12], %s1258_s15  ;;  %s293_s4 = int_to_ptr.vmem [resolvable:$true] %s292_s4 }
  0x3a   : > { %s1020_s25 = sshra.s32 %s291_s19, 4  ;;  %s1027_s26 = scalar_lea.hbm %s1391_s5, 16  ;;  %s1021_s25 = int_to_ptr.hbm [resolvable:$true] %s1020_s25 }
  0x3b   : > { %s1022_s13 = scalar_lea.hbm %s1021_s25, 8  ;;  %p1028_p5 = scmp.lt.s32.totalorder %s1021_s25, %s1391_s5 }
  0x3c   : > { %p1023_p8 = scmp.ne.s32.totalorder %s1021_s25, %s1022_s13  ;;  %p1029_p13 = scmp.lt.s32.totalorder %s1027_s26, %s1022_s13 }
  0x3e   : > { %p1025_p10 = pnand %p1023_p8, %p994_p9  ;;  %p1030_p0 = por %p1029_p13, %p1028_p5 }
  0x40   : > { %p1026_p11 = pneg %p1025_p10 }
  0x42   : > { %p1031_p2 = pnand %p1030_p0, %p1026_p11 }
  0x44   : > { %1034 = shalt.err (!%p1031_p2)
}
  0x45   : > { %811 = dma.hbm_to_vmem [thread:$0]  (!%p1275_p7), %s291_s19, 128, %s293_s4, %s281_s14  }
  0x46   : > { %301 = sbr.rel (%p1200_p3) target bundleno = 892 (0x37c), region = 44  ;;  %s1311_s1 = sand.u32 (!%p1200_p3), 1, %s1120_s22  }
  0x47   : > { %s1314_s15 = sshll.u32 (!%p1200_p3), %s1311_s1, 3  ;;  %s304_s18 = scalar_lea.sflag (!%p1200_p3), [#allocation3], %s1311_s1 }
  0x48   : > { %s307_s13 = scalar_lea.vmem (!%p1200_p3), [#allocation2], %s1314_s15 }
  0x4b   : > { %1095 = dma.done.wait (%p1251_p12), %s304_s18, 128  }
  0x4c   : > { %1097 = vsyncadd (%p1251_p12), %s304_s18, 4294967168 }
  0x4d   : > { %1099 = dma.done.wait (%p48_p1), [#allocation6], 288  }
  0x4e   : > { %1101 = vsyncadd (%p48_p1), [#allocation6], 4294967008 }
  0x4f   : > { %1103 = dma.done.wait (%p48_p1), [#allocation9], 2048  }
  0x50   : > { %1105 = vsyncadd (%p48_p1), [#allocation9], 4294965248  ;;  %s334_s4 = scalar_lea.sflag [#allocation12], %s1311_s1  ;;  %s337_s29 = scalar_lea.vmem [#allocation11], %s1314_s15 }
  0x51   : > { %1107 = dma.done.wait (%p1251_p12), %s334_s4, 128  }
  0x52   : > { %1109 = vsyncadd (%p1251_p12), %s334_s4, 4294967168  ;;  %v374_v0 = vld [vmem:[#allocation5 + $0x8] sm:$0xff]  ;;  %v373_v1 = vld [vmem:[#allocation5] sm:$0xff]  ;;  %vm375_vm0 = vcmask 130048   ;;  %vm400_vm1 = vcmask 261120   ;;  %vm469_vm2 = vcmask 64512   ;;  %v528_v59 = vlaneseq }
  0x53   : > { %393 = vmatpush.msra.mxu0 %v374_v0  ;;  %v372_v2 = vld [vmem:[%s307_s13] sm:$0xff]  ;;  %v429_v8 = vld [vmem:[#allocation8 + $0x10] sm:$0xff]  ;;  %vm538_vm8 = vcmask 1041409   ;;  %vm540_vm9 = vcmask 1042434   ;;  %vm542_vm11 = vcmask 1043459   ;;  %vm544_vm12 = vcmask 1044484  }
  0x54   : > { %v399_v4 = vld [vmem:[#allocation7] sm:$0x3]  ;;  %v431_v5 = vld [vmem:[#allocation8 + $0x20] sm:$0xff]  ;;  %v446_v9 = vld [vmem:[#allocation10 + $0x10] sm:$0xff]  ;;  %v529_v63 = vand.u32 127, %v528_v59  ;;  %vm546_vm15 = vcmask 1045509  }
  0x55   : > { %394 = vmatpush.msra.mxu0 %v373_v1  ;;  %v448_v7 = vld [vmem:[#allocation10 + $0x20] sm:$0xff]  ;;  %v432_v18 = vld [vmem:[#allocation8 + $0x28] sm:$0xff]  ;;  %v430_v22 = vld [vmem:[#allocation8 + $0x18] sm:$0xff]  ;;  %s767_s11 = sshll.u32 %s1195_s28, 3  ;;  %s371_s10 = scalar_lea.vmem [#allocation13], %s1314_s15 }
  0x56   : > { %761 = vmatmul.msk.f32.vlgmr.msra.gmra.mxu0 %vm375_vm0, %v372_v2  ;;  %v427_v12 = vld [vmem:[#allocation8] sm:$0xff]  ;;  %v449_v19 = vld [vmem:[#allocation10 + $0x28] sm:$0xff]  ;;  %v447_v23 = vld [vmem:[#allocation10 + $0x18] sm:$0xff]  ;;  %vm548_vm0 = vcmask 1046534   ;;  %s606_s8 = scalar_lea.hbm %s1392_s6, %s767_s11  ;;  %s608_s19 = sshll.u32 %s371_s10, 4  ;;  %s609_s19 = int_to_ptr.vmem [resolvable:$true] %s608_s19 }
  0x57   : > { %v444_v13 = vld [vmem:[#allocation10] sm:$0xff]  ;;  %v428_v26 = vld [vmem:[#allocation8 + $0x8] sm:$0xff]  ;;  %v434_v41 = vld [vmem:[#allocation8 + $0x38] sm:$0xff]  ;;  %s610_s12 = sshll.u32 %s606_s8, 4  ;;  %s596_s14 = scalar_lea.sflag [#allocation4], %s1311_s1  ;;  %s611_s12 = int_to_ptr.hbm [resolvable:$true] %s610_s12 }
  0x58   : > { %v445_v27 = vld [vmem:[#allocation10 + $0x8] sm:$0xff]  ;;  %v451_v42 = vld [vmem:[#allocation10 + $0x38] sm:$0xff]  ;;  %v433_v43 = vld [vmem:[#allocation8 + $0x30] sm:$0xff]  ;;  %s1064_s25 = sshra.s32 %s611_s12, 4  ;;  %s1070_s26 = scalar_lea.hbm %s1392_s6, 16  ;;  %s1065_s25 = int_to_ptr.hbm [resolvable:$true] %s1064_s25 }
  0x59   : > { %v450_v44 = vld [vmem:[#allocation10 + $0x30] sm:$0xff]  ;;  %s1066_s28 = scalar_lea.hbm %s1065_s25, 8  ;;  %p1071_p7 = scmp.lt.s32.totalorder %s1065_s25, %s1392_s6 }
  0x5a   : > { %p1067_p1 = scmp.ne.s32.totalorder %s1065_s25, %s1066_s28  ;;  %p1072_p9 = scmp.lt.s32.totalorder %s1070_s26, %s1066_s28 }
  0x5c   : > { %p1068_p3 = pnand %p1067_p1, %p1260_p4  ;;  %p1073_p8 = por %p1072_p9, %p1071_p7 }
  0x5e   : > { %p1069_p12 = pneg %p1068_p3 }
  0x60   : > { %p1074_p10 = pnand %p1073_p8, %p1069_p12 }
  0xd3   : > { %v396_v3 = vpop.f32.mrf.mxu0 }
  0xd4   : > { %762 = vmatpush.xpose.msk.msra.mxu1 %vm400_vm1, %v396_v3  ;;  %583 = vmatpush.msra.mxu2 %v396_v3 }
  0xd7   : > { %763 = vmatmul.msk.f32.vlgmr.msra.gmra.mxu1 %vm400_vm1, %v399_v4 }
 0x154   : > { %v424_v6 = vpop.f32.mrf.mxu1 }
 0x155   : > { %v435_v10 = vperm.slane %v424_v6, 0  ;;  %v452_v11 = vperm.slane %v424_v6, 1 }
 0x157   : > { %v440_v14 = vmul.f32 %v435_v10, %v431_v5  ;;  %v457_v15 = vmul.f32 %v452_v11, %v448_v7  ;;  %v438_v16 = vmul.f32 %v435_v10, %v429_v8  ;;  %v455_v17 = vmul.f32 %v452_v11, %v446_v9 }
 0x158   : > { %v436_v20 = vmul.f32 %v435_v10, %v427_v12  ;;  %v453_v21 = vmul.f32 %v452_v11, %v444_v13  ;;  %v441_v29 = vmul.f32 %v435_v10, %v432_v18  ;;  %v458_v30 = vmul.f32 %v452_v11, %v449_v19 }
 0x159   : > { %v465_v24 = vadd.f32 %v457_v15, %v440_v14  ;;  %v463_v25 = vadd.f32 %v455_v17, %v438_v16  ;;  %v439_v33 = vmul.f32 %v435_v10, %v430_v22  ;;  %v456_v34 = vmul.f32 %v452_v11, %v447_v23 }
 0x15a   : > { %v461_v28 = vadd.f32 %v453_v21, %v436_v20  ;;  %v437_v36 = vmul.f32 %v435_v10, %v428_v26  ;;  %v454_v37 = vmul.f32 %v452_v11, %v445_v27  ;;  %v466_v38 = vadd.f32 %v458_v30, %v441_v29 }
 0x15b   : > { %v482_v31 = vsel %vm469_vm2, %v465_v24, 0.0  ;;  %v476_v32 = vsel %vm469_vm2, %v463_v25, 0.0  ;;  %v464_v39 = vadd.f32 %v456_v34, %v439_v33  ;;  %v443_v47 = vmul.f32 %v435_v10, %v434_v41  ;;  %v518_v25 = vld [vmem:[%s337_s29] sm:$0xff] }
 0x15c   : > { %483 = vadd.xlane.f32.xlu2 %v482_v31  ;;  %477 = vadd.xlane.f32.xlu1 %v476_v32  ;;  %v470_v35 = vsel %vm469_vm2, %v461_v28, 0.0  ;;  %v462_v40 = vadd.f32 %v454_v37, %v437_v36  ;;  %v485_v45 = vsel %vm469_vm2, %v466_v38, 0.0  ;;  %v460_v48 = vmul.f32 %v452_v11, %v451_v42 }
 0x15d   : > { %471 = vadd.xlane.f32.xlu0 %v470_v35  ;;  %v479_v46 = vsel %vm469_vm2, %v464_v39, 0.0  ;;  %v442_v50 = vmul.f32 %v435_v10, %v433_v43  ;;  %v459_v51 = vmul.f32 %v452_v11, %v450_v44 }
 0x15e   : > { %v473_v49 = vsel %vm469_vm2, %v462_v40, 0.0  ;;  %v468_v52 = vadd.f32 %v460_v48, %v443_v47 }
 0x15f   : > { %v467_v53 = vadd.f32 %v459_v51, %v442_v50 }
 0x160   : > { %v491_v54 = vsel %vm469_vm2, %v468_v52, 0.0 }
 0x161   : > { %v488_v55 = vsel %vm469_vm2, %v467_v53, 0.0 }
 0x164   : > { %486 = vadd.xlane.f32.xlu2 %v485_v45  ;;  %480 = vadd.xlane.f32.xlu1 %v479_v46 }
 0x165   : > { %474 = vadd.xlane.f32.xlu0 %v473_v49 }
 0x16c   : > { %492 = vadd.xlane.f32.xlu1 %v491_v54 }
 0x16d   : > { %489 = vadd.xlane.f32.xlu0 %v488_v55 }
 0x1cf   : > { %v484_v56 = vpop.xlane.xlu2 %483  ;;  %v478_v57 = vpop.xlane.xlu1 %477 }
 0x1d0   : > { %v472_v58 = vpop.xlane.xlu0 %471  ;;  %v504_v61 = vmul.f32 0.01, %v478_v57  ;;  %vm496_vm4 = vcmp.gt.f32.partialorder %v478_v57, 0.0  ;;  %v506_v0 = vmul.f32 0.01, %v484_v56  ;;  %vm498_vm6 = vcmp.gt.f32.partialorder %v484_v56, 0.0 }
 0x1d1   : > { %v502_v60 = vmul.f32 0.01, %v472_v58  ;;  %vm494_vm3 = vcmp.gt.f32.partialorder %v472_v58, 0.0 }
 0x1d2   : > { %v512_v6 = vsel %vm496_vm4, %v478_v57, %v504_v61  ;;  %v514_v9 = vsel %vm498_vm6, %v484_v56, %v506_v0  ;;  %vm519_vm4 = vcmp.gt.f32.partialorder %v518_v25, 0.0 }
 0x1d3   : > { %v510_v3 = vsel %vm494_vm3, %v472_v58, %v502_v60  ;;  %v532_v13 = vperm.slane %v512_v6, %v529_v63  ;;  %v534_v16 = vperm.slane %v514_v9, %v529_v63  ;;  %vm550_vm3 = vcmask 1047559  }
 0x1d4   : > { %v530_v10 = vperm.slane %v510_v3, %v529_v63 }
 0x1d7   : > { %v481_v62 = vpop.xlane.xlu1 %480  ;;  %v487_v4 = vpop.xlane.xlu2 %486 }
 0x1d8   : > { %vm497_vm5 = vcmp.gt.f32.partialorder %v481_v62, 0.0  ;;  %v505_v1 = vmul.f32 0.01, %v481_v62  ;;  %v475_v2 = vpop.xlane.xlu0 %474  ;;  %v507_v11 = vmul.f32 0.01, %v487_v4  ;;  %vm499_vm10 = vcmp.gt.f32.partialorder %v487_v4, 0.0 }
 0x1d9   : > { %vm495_vm7 = vcmp.gt.f32.partialorder %v475_v2, 0.0  ;;  %v503_v5 = vmul.f32 0.01, %v475_v2 }
 0x1da   : > { %v513_v7 = vsel %vm497_vm5, %v481_v62, %v505_v1  ;;  %v515_v19 = vsel %vm499_vm10, %v487_v4, %v507_v11 }
 0x1db   : > { %v511_v8 = vsel %vm495_vm7, %v475_v2, %v503_v5  ;;  %v533_v14 = vperm.slane %v513_v7, %v529_v63  ;;  %v535_v27 = vperm.slane %v515_v19, %v529_v63 }
 0x1dc   : > { %v531_v12 = vperm.slane %v511_v8, %v529_v63 }
 0x1de   : > { %v539_v15 = vsel %vm538_vm8, %v531_v12, %v530_v10 }
 0x1df   : > { %v541_v17 = vsel %vm540_vm9, %v532_v13, %v539_v15  ;;  %v493_v18 = vpop.xlane.xlu1 %492 }
 0x1e0   : > { %vm501_vm13 = vcmp.gt.f32.partialorder %v493_v18, 0.0  ;;  %v509_v20 = vmul.f32 0.01, %v493_v18  ;;  %v490_v21 = vpop.xlane.xlu0 %489  ;;  %v543_v22 = vsel %vm542_vm11, %v533_v14, %v541_v17 }
 0x1e1   : > { %vm500_vm14 = vcmp.gt.f32.partialorder %v490_v21, 0.0  ;;  %v508_v23 = vmul.f32 0.01, %v490_v21  ;;  %v545_v26 = vsel %vm544_vm12, %v534_v16, %v543_v22 }
 0x1e2   : > { %v517_v24 = vsel %vm501_vm13, %v493_v18, %v509_v20  ;;  %v547_v31 = vsel %vm546_vm15, %v535_v27, %v545_v26 }
 0x1e3   : > { %v537_v28 = vperm.slane %v517_v24, %v529_v63  ;;  %v516_v29 = vsel %vm500_vm14, %v490_v21, %v508_v23 }
 0x1e4   : > { %v536_v30 = vperm.slane %v516_v29, %v529_v63 }
 0x1e6   : > { %v549_v32 = vsel %vm548_vm0, %v536_v30, %v547_v31 }
 0x1e7   : > { %v551_v33 = vsel %vm550_vm3, %v537_v28, %v549_v32 }
 0x1e8   : > { %v553_v34 = vsel %vm519_vm4, %v551_v33, -9e+15 }
 0x1e9   : > { %v554_v35 = vsel %vm469_vm2, %v553_v34, -inf }
 0x1ea   : > { %555 = vmax.xlane.f32.xlu2 %v554_v35 }
 0x25d   : > { %v556_v36 = vpop.xlane.xlu2 %555 }
 0x25e   : > { %v557_v37 = vsub.f32 %v553_v34, %v556_v36 }
 0x260   : > { %v558_v38 = vmul.f32 1.442695, %v557_v37 }
 0x262   : > { %864 = vpow2.f32 %v558_v38 }
 0x268   : > { %v865_v39 = vpop.eup %864 }
 0x269   : > { %v560_v40 = vsel %vm469_vm2, %v865_v39, 0.0 }
 0x26a   : > { %561 = vadd.xlane.f32.xlu0 %v560_v40 }
 0x2dd   : > { %v562_v41 = vpop.xlane.xlu0 %561 }
 0x2de   : > { %866 = vrcp.f32 %v562_v41 }
 0x2e4   : > { %v867_v42 = vpop.eup %866 }
 0x2e5   : > { %v564_v43 = vmul.f32 %v867_v42, %v865_v39 }
 0x2e7   : > { %764 = vmatmul.msk.f32.vlgmr.msra.gmra.mxu2 %vm469_vm2, %v564_v43 }
 0x36a   : > { %v585_v44 = vpop.f32.mrf.mxu2 }
 0x36b   : > { %v589_v45 = vmin.f32 %v585_v44, 0.0  ;;  %vm588_vm5 = vcmp.gt.f32.partialorder %v585_v44, 0.0 }
 0x36d   : > { %v590_v46 = vmul.f32 1.442695, %v589_v45 }
 0x36f   : > { %868 = vpow2.f32 %v590_v46 }
 0x375   : > { %v869_v47 = vpop.eup %868 }
 0x376   : > { %v765_v48 = vadd.f32 -1.0, %v869_v47 }
 0x378   : > { %v593_v49 = vsel %vm588_vm5, %v585_v44, %v765_v48 }
 0x379   : > { %594 = vst.msk [vmem:[%s371_s10] sm:$0xff] %vm400_vm1, %v593_v49 }
 0x37a   : > { %1077 = shalt.err (!%p1074_p10)
}
 0x37b   : > { %790 = dma.vmem_to_hbm [thread:$0]  (%p1260_p4), %s609_s19, 128, %s611_s12, %s596_s14  }
 0x37c PF: > { %s622_s1 = sand.u32 1, %s1116_s21   ;;  %p1409_p11 = scmp.ge.s32.totalorder %s1128_s24, 2 }
 0x37d   : > { %s623_s15 = scalar_lea.sflag [#allocation4], %s622_s1 }
 0x37e   : > { %p813_p5 = pnand %p1409_p11, %p1264_p6 }
 0x380   : > { %p814_p13 = pneg %p813_p5 }
 0x382   : > { %1111 = dma.done.wait (%p814_p13), %s623_s15, 128  }
 0x383   : > { %1113 = vsyncadd (%p814_p13), %s623_s15, 4294967168  ;;  %s1410_s18 = sld [smem:[#allocation19_spill]]  ;;  %p24_p0 = scmp.ge.s32.totalorder %s1232_s9, 4  }
 0x384   : > { %s1411_s21 = smov %s1120_s22  ;;  %s1412_s22 = smov %s1124_s23 }
 0x385   : > { %s1414_s24 = smov %s1232_s9  ;;  %26 = sbr.rel (!%p24_p0) target bundleno = 14 (0xe), region = 118 }
 0x389   : > { %s1413_s23 = smov %s1410_s18 }
 0x38a   :  { %629 = vsyncpa [#allocation3], 1 }
 0x38b   :  { %631 = vsyncpa [#allocation3 + $0x1], 1 }
 0x38c   :  { %632 = vsyncpa [#allocation6], 1 }
 0x38d   :  { %633 = vsyncpa [#allocation9], 1 }
 0x38e   :  { %634 = vsyncpa [#allocation12], 1 }
 0x38f   :  { %636 = vsyncpa [#allocation12 + $0x1], 1 }
 0x390   :  { %637 = vsyncpa [#allocation4], 1 }
 0x391   :  { %639 = vsyncpa [#allocation4 + $0x1], 1 }

</bundles_post_ra>
